<compile_context>
chip_gen: v6e
topology: v6e:2x2x1
jax: 0.10.0
libtpu: 0.0.40
codegen_flags: <defaults>
</compile_context>

<pallas_src>
import functools

import jax
import jax.numpy as jnp
from jax import lax
from jax.experimental import pallas as pl
from jax.experimental.pallas import tpu as pltpu


def _shared_decoder_kernel(*refs, num_layers, activations):
    """Fused decoder: for each layer, sample W,b -> matmul -> bias -> act."""
    # refs = (x_ref, [w_mu, w_ls, w_eps, b_mu, b_ls, b_eps] * L, o_ref)
    x_ref = refs[0]
    o_ref = refs[-1]

    h = x_ref[...].astype(jnp.float32)                 # (tile_b, d_in0)
    for l in range(num_layers):
        wmu, wls, weps, bmu, bls, beps = refs[1 + 6 * l: 1 + 6 * (l + 1)]
        # Reparameterized samples (elementwise; exp lowers to the EUP slot).
        w = wmu[...] + weps[...] * jnp.exp(wls[...])   # (d_out, d_in)
        b = bmu[...] + beps[...] * jnp.exp(bls[...])   # (1, d_out)
        # y = h @ W.T == einsum('ij,bj->bi', W, h): contract d_in on both
        # operands (no explicit XLU transpose of W), MXU with f32 accumulate.
        y = lax.dot_general(
            h, w,
            dimension_numbers=(((1,), (1,)), ((), ())),
            preferred_element_type=jnp.float32,
        ) + b
        h = activations[l](y)

    o_ref[...] = h.astype(o_ref.dtype)


def shared_decoder_forward(x, params, eps, activations, *, block_b=512):
    """SharedDecoder.forward (sampling path) as one fused Pallas kernel.

    params[l] = (w_mu (d_out,d_in), w_log_sigma (d_out,d_in),
                 b_mu (1,d_out),   b_log_sigma (1,d_out))
    eps[l]    = (eps_W (d_out,d_in), eps_b (1,d_out))
    """
    B, _ = x.shape
    num_layers = len(params)
    d_in0 = params[0][0].shape[1]
    d_out_last = params[-1][0].shape[0]

    block_b = min(block_b, B)
    grid = (pl.cdiv(B, block_b),)

    in_specs = [pl.BlockSpec((block_b, d_in0), lambda i: (i, 0))]  # batch-tiled
    flat_inputs = [x]
    for (w_mu, w_ls, b_mu, b_ls), (w_eps, b_eps) in zip(params, eps):
        d_out, d_in = w_mu.shape
        # Full-extent blocks, constant index_map -> resident in VMEM across
        # batch tiles (no re-DMA per grid step). Full-extent satisfies the
        # (8,128) rule for these small layer dims.
        w_spec = pl.BlockSpec((d_out, d_in), lambda i: (0, 0))
        b_spec = pl.BlockSpec((1, d_out), lambda i: (0, 0))
        in_specs += [w_spec, w_spec, w_spec, b_spec, b_spec, b_spec]
        flat_inputs += [w_mu, w_ls, w_eps, b_mu, b_ls, b_eps]

    kernel = functools.partial(
        _shared_decoder_kernel,
        num_layers=num_layers,
        activations=tuple(activations),
    )

    return pl.pallas_call(
        kernel,
        out_shape=jax.ShapeDtypeStruct((B, d_out_last), x.dtype),
        grid=grid,
        in_specs=in_specs,
        out_specs=pl.BlockSpec((block_b, d_out_last), lambda i: (i, 0)),
        compiler_params=pltpu.CompilerParams(
            dimension_semantics=("parallel",),
        ),
    )(*flat_inputs)


# ---------------- pure-JAX reference (matches the torch math) ----------------

def shared_decoder_ref(x, params, eps, activations):
    h = x
    for (w_mu, w_ls, b_mu, b_ls), (w_eps, b_eps), act in zip(params, eps, activations):
        w = w_mu + w_eps * jnp.exp(w_ls)
        b = b_mu + b_eps * jnp.exp(b_ls)
        y = jnp.dot(h, w.T, precision=lax.Precision.HIGHEST,
                    preferred_element_type=jnp.float32) + b
        h = act(y)
    return h


# ---------------- init (mirrors torch _init_weights / _init_log_sigma) -------

def init_shared_decoder(key, dims):
    params = []
    for i in range(len(dims) - 1):
        d_in, d_out = dims[i], dims[i + 1]
        key, kw = jax.random.split(key)
        scale = (6.0 / (d_in + d_out)) ** 0.5
        w_mu = jax.random.uniform(kw, (d_out, d_in), jnp.float32, -scale, scale)
        w_ls = jnp.full((d_out, d_in), -6.0, jnp.float32)
        # torch bias is (d_out,); stored here as (1, d_out) — identical broadcast.
        b_mu = jnp.zeros((1, d_out), jnp.float32)
        b_ls = jnp.full((1, d_out), -6.0, jnp.float32)
        params.append((w_mu, w_ls, b_mu, b_ls))
    return params, key


if __name__ == "__main__":
    key = jax.random.PRNGKey(0)

    # Small decoder: dims (32 -> 64 -> 16), activations (relu, sigmoid), batch 8.
    dims = (32, 64, 16)
    activations = (jax.nn.relu, jax.nn.sigmoid)
    batch = 8

    params, key = init_shared_decoder(key, dims)

    key, kx = jax.random.split(key)
    x = jax.random.normal(kx, (batch, dims[0]), dtype=jnp.float32)

    # torch.randn_like noise for the reparameterized samples (deterministic here).
    eps = []
    for (w_mu, _, b_mu, _) in params:
        key, k1, k2 = jax.random.split(key, 3)
        eps.append((jax.random.normal(k1, w_mu.shape, jnp.float32),
                    jax.random.normal(k2, b_mu.shape, jnp.float32)))

    y = shared_decoder_forward(x, params, eps, activations)
    jax.block_until_ready(y)

    y_ref = shared_decoder_ref(x, params, eps, activations)

    assert y.shape == (batch, dims[-1]), (y.shape, (batch, dims[-1]))
    assert y.dtype == x.dtype, (y.dtype, x.dtype)
    assert bool(jnp.allclose(y, y_ref, rtol=2e-3, atol=2e-3)), "mismatch vs reference"

    # TODO(synk): KL_from_prior / update_prior / get_posterior are training-time
    # utilities outside forward() and are intentionally not implemented as kernels.
    print("KERNEL_OK")
</pallas_src>

<mosaic_0001>
module attributes {stable_mosaic.version = 11 : i64} {
  func.func @_shared_decoder_kernel(%arg0: i32, %arg1: memref<8x32xf32, #tpu.memory_space<vmem>>, %arg2: memref<64x32xf32, #tpu.memory_space<vmem>>, %arg3: memref<64x32xf32, #tpu.memory_space<vmem>>, %arg4: memref<64x32xf32, #tpu.memory_space<vmem>>, %arg5: memref<1x64xf32, #tpu.memory_space<vmem>>, %arg6: memref<1x64xf32, #tpu.memory_space<vmem>>, %arg7: memref<1x64xf32, #tpu.memory_space<vmem>>, %arg8: memref<16x64xf32, #tpu.memory_space<vmem>>, %arg9: memref<16x64xf32, #tpu.memory_space<vmem>>, %arg10: memref<16x64xf32, #tpu.memory_space<vmem>>, %arg11: memref<1x16xf32, #tpu.memory_space<vmem>>, %arg12: memref<1x16xf32, #tpu.memory_space<vmem>>, %arg13: memref<1x16xf32, #tpu.memory_space<vmem>>, %arg14: memref<8x16xf32, #tpu.memory_space<vmem>>) attributes {dimension_semantics = [#tpu.dimension_semantics<parallel>], iteration_bounds = array<i64: 1>, scalar_prefetch = 0 : i64, scratch_operands = 0 : i64, tpu.core_type = #tpu.core_type<tc>, window_params = [{transform_indices = @transform_0, window_bounds = array<i64: 8, 32>}, {pipeline_mode = #tpu.pipeline_mode<synchronous>, transform_indices = @transform_1, window_bounds = array<i64: 64, 32>}, {pipeline_mode = #tpu.pipeline_mode<synchronous>, transform_indices = @transform_2, window_bounds = array<i64: 64, 32>}, {pipeline_mode = #tpu.pipeline_mode<synchronous>, transform_indices = @transform_3, window_bounds = array<i64: 64, 32>}, {pipeline_mode = #tpu.pipeline_mode<synchronous>, transform_indices = @transform_4, window_bounds = array<i64: 1, 64>}, {pipeline_mode = #tpu.pipeline_mode<synchronous>, transform_indices = @transform_5, window_bounds = array<i64: 1, 64>}, {pipeline_mode = #tpu.pipeline_mode<synchronous>, transform_indices = @transform_6, window_bounds = array<i64: 1, 64>}, {pipeline_mode = #tpu.pipeline_mode<synchronous>, transform_indices = @transform_7, window_bounds = array<i64: 16, 64>}, {pipeline_mode = #tpu.pipeline_mode<synchronous>, transform_indices = @transform_8, window_bounds = array<i64: 16, 64>}, {pipeline_mode = #tpu.pipeline_mode<synchronous>, transform_indices = @transform_9, window_bounds = array<i64: 16, 64>}, {pipeline_mode = #tpu.pipeline_mode<synchronous>, transform_indices = @transform_10, window_bounds = array<i64: 1, 16>}, {pipeline_mode = #tpu.pipeline_mode<synchronous>, transform_indices = @transform_11, window_bounds = array<i64: 1, 16>}, {pipeline_mode = #tpu.pipeline_mode<synchronous>, transform_indices = @transform_12, window_bounds = array<i64: 1, 16>}, {transform_indices = @transform_13, window_bounds = array<i64: 8, 16>}]} {
    %c0 = arith.constant 0 : index
    %c0_0 = arith.constant 0 : index
    %0 = vector.load %arg1[%c0, %c0_0] : memref<8x32xf32, #tpu.memory_space<vmem>>, vector<8x32xf32>
    %c0_1 = arith.constant 0 : index
    %c0_2 = arith.constant 0 : index
    %1 = vector.load %arg2[%c0_1, %c0_2] : memref<64x32xf32, #tpu.memory_space<vmem>>, vector<64x32xf32>
    %c0_3 = arith.constant 0 : index
    %c0_4 = arith.constant 0 : index
    %2 = vector.load %arg4[%c0_3, %c0_4] : memref<64x32xf32, #tpu.memory_space<vmem>>, vector<64x32xf32>
    %c0_5 = arith.constant 0 : index
    %c0_6 = arith.constant 0 : index
    %3 = vector.load %arg3[%c0_5, %c0_6] : memref<64x32xf32, #tpu.memory_space<vmem>>, vector<64x32xf32>
    %4 = math.exp %3 : vector<64x32xf32>
    %5 = arith.mulf %2, %4 : vector<64x32xf32>
    %6 = arith.addf %1, %5 : vector<64x32xf32>
    %c0_7 = arith.constant 0 : index
    %c0_8 = arith.constant 0 : index
    %7 = vector.load %arg5[%c0_7, %c0_8] : memref<1x64xf32, #tpu.memory_space<vmem>>, vector<1x64xf32>
    %c0_9 = arith.constant 0 : index
    %c0_10 = arith.constant 0 : index
    %8 = vector.load %arg7[%c0_9, %c0_10] : memref<1x64xf32, #tpu.memory_space<vmem>>, vector<1x64xf32>
    %c0_11 = arith.constant 0 : index
    %c0_12 = arith.constant 0 : index
    %9 = vector.load %arg6[%c0_11, %c0_12] : memref<1x64xf32, #tpu.memory_space<vmem>>, vector<1x64xf32>
    %10 = math.exp %9 : vector<1x64xf32>
    %11 = arith.mulf %8, %10 : vector<1x64xf32>
    %12 = arith.addf %7, %11 : vector<1x64xf32>
    %cst = arith.constant dense<0.000000e+00> : vector<8x64xf32>
    %13 = tpu.matmul %0, %6, %cst {dimension_numbers = #tpu.dot_dimension_numbers<[1], [1], [0], [0], [0, 0, 1, 0], [], []>} : vector<8x32xf32>, vector<64x32xf32>, vector<8x64xf32> -> vector<8x64xf32>
    %14 = vector.broadcast %12 : vector<1x64xf32> to vector<8x64xf32>
    %15 = arith.addf %13, %14 : vector<8x64xf32>
    %cst_13 = arith.constant 0.000000e+00 : f32
    %16 = vector.broadcast %cst_13 : f32 to vector<8x64xf32>
    %17 = arith.maximumf %15, %16 : vector<8x64xf32>
    %c0_14 = arith.constant 0 : index
    %c0_15 = arith.constant 0 : index
    %18 = vector.load %arg8[%c0_14, %c0_15] : memref<16x64xf32, #tpu.memory_space<vmem>>, vector<16x64xf32>
    %c0_16 = arith.constant 0 : index
    %c0_17 = arith.constant 0 : index
    %19 = vector.load %arg10[%c0_16, %c0_17] : memref<16x64xf32, #tpu.memory_space<vmem>>, vector<16x64xf32>
    %c0_18 = arith.constant 0 : index
    %c0_19 = arith.constant 0 : index
    %20 = vector.load %arg9[%c0_18, %c0_19] : memref<16x64xf32, #tpu.memory_space<vmem>>, vector<16x64xf32>
    %21 = math.exp %20 : vector<16x64xf32>
    %22 = arith.mulf %19, %21 : vector<16x64xf32>
    %23 = arith.addf %18, %22 : vector<16x64xf32>
    %c0_20 = arith.constant 0 : index
    %c0_21 = arith.constant 0 : index
    %24 = vector.load %arg11[%c0_20, %c0_21] : memref<1x16xf32, #tpu.memory_space<vmem>>, vector<1x16xf32>
    %c0_22 = arith.constant 0 : index
    %c0_23 = arith.constant 0 : index
    %25 = vector.load %arg13[%c0_22, %c0_23] : memref<1x16xf32, #tpu.memory_space<vmem>>, vector<1x16xf32>
    %c0_24 = arith.constant 0 : index
    %c0_25 = arith.constant 0 : index
    %26 = vector.load %arg12[%c0_24, %c0_25] : memref<1x16xf32, #tpu.memory_space<vmem>>, vector<1x16xf32>
    %27 = math.exp %26 : vector<1x16xf32>
    %28 = arith.mulf %25, %27 : vector<1x16xf32>
    %29 = arith.addf %24, %28 : vector<1x16xf32>
    %cst_26 = arith.constant dense<0.000000e+00> : vector<8x16xf32>
    %30 = tpu.matmul %17, %23, %cst_26 {dimension_numbers = #tpu.dot_dimension_numbers<[1], [1], [0], [0], [0, 0, 1, 0], [], []>} : vector<8x64xf32>, vector<16x64xf32>, vector<8x16xf32> -> vector<8x16xf32>
    %31 = vector.broadcast %29 : vector<1x16xf32> to vector<8x16xf32>
    %32 = arith.addf %30, %31 : vector<8x16xf32>
    %33 = arith.negf %32 : vector<8x16xf32>
    %34 = math.exp %33 : vector<8x16xf32>
    %cst_27 = arith.constant 1.000000e+00 : f32
    %35 = vector.broadcast %cst_27 : f32 to vector<8x16xf32>
    %36 = arith.addf %35, %34 : vector<8x16xf32>
    %37 = arith.divf %35, %36 : vector<8x16xf32>
    %c0_28 = arith.constant 0 : index
    %c0_29 = arith.constant 0 : index
    %38 = vector.load %arg14[%c0_28, %c0_29] : memref<8x16xf32, #tpu.memory_space<vmem>>, vector<8x16xf32>
    tpu.vector_store %arg14[%c0_28, %c0_29], %37 {strides = array<i32>} : memref<8x16xf32, #tpu.memory_space<vmem>>, vector<8x16xf32>,
    return
  }
  func.func @transform_0(%arg0: i32) -> (i32, i32) {
    %c0_i32 = arith.constant 0 : i32
    %c0_i32_0 = arith.constant 0 : i32
    return %arg0, %c0_i32 : i32, i32
  }
  func.func @transform_1(%arg0: i32) -> (i32, i32) {
    %c0_i32 = arith.constant 0 : i32
    %c0_i32_0 = arith.constant 0 : i32
    %c0_i32_1 = arith.constant 0 : i32
    return %c0_i32, %c0_i32_0 : i32, i32
  }
  func.func @transform_2(%arg0: i32) -> (i32, i32) {
    %c0_i32 = arith.constant 0 : i32
    %c0_i32_0 = arith.constant 0 : i32
    %c0_i32_1 = arith.constant 0 : i32
    return %c0_i32, %c0_i32_0 : i32, i32
  }
  func.func @transform_3(%arg0: i32) -> (i32, i32) {
    %c0_i32 = arith.constant 0 : i32
    %c0_i32_0 = arith.constant 0 : i32
    %c0_i32_1 = arith.constant 0 : i32
    return %c0_i32, %c0_i32_0 : i32, i32
  }
  func.func @transform_4(%arg0: i32) -> (i32, i32) {
    %c0_i32 = arith.constant 0 : i32
    %c0_i32_0 = arith.constant 0 : i32
    %c0_i32_1 = arith.constant 0 : i32
    return %c0_i32, %c0_i32_0 : i32, i32
  }
  func.func @transform_5(%arg0: i32) -> (i32, i32) {
    %c0_i32 = arith.constant 0 : i32
    %c0_i32_0 = arith.constant 0 : i32
    %c0_i32_1 = arith.constant 0 : i32
    return %c0_i32, %c0_i32_0 : i32, i32
  }
  func.func @transform_6(%arg0: i32) -> (i32, i32) {
    %c0_i32 = arith.constant 0 : i32
    %c0_i32_0 = arith.constant 0 : i32
    %c0_i32_1 = arith.constant 0 : i32
    return %c0_i32, %c0_i32_0 : i32, i32
  }
  func.func @transform_7(%arg0: i32) -> (i32, i32) {
    %c0_i32 = arith.constant 0 : i32
    %c0_i32_0 = arith.constant 0 : i32
    %c0_i32_1 = arith.constant 0 : i32
    return %c0_i32, %c0_i32_0 : i32, i32
  }
  func.func @transform_8(%arg0: i32) -> (i32, i32) {
    %c0_i32 = arith.constant 0 : i32
    %c0_i32_0 = arith.constant 0 : i32
    %c0_i32_1 = arith.constant 0 : i32
    return %c0_i32, %c0_i32_0 : i32, i32
  }
  func.func @transform_9(%arg0: i32) -> (i32, i32) {
    %c0_i32 = arith.constant 0 : i32
    %c0_i32_0 = arith.constant 0 : i32
    %c0_i32_1 = arith.constant 0 : i32
    return %c0_i32, %c0_i32_0 : i32, i32
  }
  func.func @transform_10(%arg0: i32) -> (i32, i32) {
    %c0_i32 = arith.constant 0 : i32
    %c0_i32_0 = arith.constant 0 : i32
    %c0_i32_1 = arith.constant 0 : i32
    return %c0_i32, %c0_i32_0 : i32, i32
  }
  func.func @transform_11(%arg0: i32) -> (i32, i32) {
    %c0_i32 = arith.constant 0 : i32
    %c0_i32_0 = arith.constant 0 : i32
    %c0_i32_1 = arith.constant 0 : i32
    return %c0_i32, %c0_i32_0 : i32, i32
  }
  func.func @transform_12(%arg0: i32) -> (i32, i32) {
    %c0_i32 = arith.constant 0 : i32
    %c0_i32_0 = arith.constant 0 : i32
    %c0_i32_1 = arith.constant 0 : i32
    return %c0_i32, %c0_i32_0 : i32, i32
  }
  func.func @transform_13(%arg0: i32) -> (i32, i32) {
    %c0_i32 = arith.constant 0 : i32
    %c0_i32_0 = arith.constant 0 : i32
    return %arg0, %c0_i32 : i32, i32
  }
}

</mosaic_0001>

<bundles_post_ra>
// kernel: tpu_custom_call.1
= control target key start
LH: loop header
LB: loop body
LE: loop exit
PB: predicated region body
PF: predicated region fallthrough
CT: control target
= control target key end

     0   :  { %v447_v1 = vmov 0.0   ;;  %vm448_vm0 = vmmov 0   ;;  %s658_s0 = inlined_call_operand.vmem [shape: f32[8,32], index: 0, kind: input, shape index: {}]   ;;  %s659_s1 = inlined_call_operand.vmem [shape: f32[64,32], index: 1, kind: input, shape index: {}]   ;;  %s660_s2 = inlined_call_operand.vmem [shape: f32[64,32], index: 2, kind: input, shape index: {}]   ;;  %s661_s3 = inlined_call_operand.vmem [shape: f32[64,32], index: 3, kind: input, shape index: {}]   ;;  %s662_s4 = inlined_call_operand.vmem [shape: f32[1,64], index: 4, kind: input, shape index: {}]   ;;  %s663_s5 = inlined_call_operand.vmem [shape: f32[1,64], index: 5, kind: input, shape index: {}]   ;;  %s664_s6 = inlined_call_operand.vmem [shape: f32[1,64], index: 6, kind: input, shape index: {}]   ;;  %s665_s7 = inlined_call_operand.vmem [shape: f32[16,64], index: 7, kind: input, shape index: {}]   ;;  %s666_s8 = inlined_call_operand.vmem [shape: f32[16,64], index: 8, kind: input, shape index: {}]   ;;  %s667_s9 = inlined_call_operand.vmem [shape: f32[16,64], index: 9, kind: input, shape index: {}]   ;;  %s668_s10 = inlined_call_operand.vmem [shape: f32[1,16], index: 10, kind: input, shape index: {}]   ;;  %s669_s11 = inlined_call_operand.vmem [shape: f32[1,16], index: 11, kind: input, shape index: {}]   ;;  %s670_s12 = inlined_call_operand.vmem [shape: f32[1,16], index: 12, kind: input, shape index: {}]   ;;  %s671_s13 = inlined_call_operand.hbm [shape: f32[8,16], index: 13, kind: output, shape index: {}]  }
   0x1   :  { %v69_v0 = vld [vmem:[%s660_s2 + $0x38] sm:$0xff]  ;;  %368 = vmatprep.subr.mxu0 %v447_v1  ;;  %v68_v3 = vld [vmem:[%s660_s2 + $0x30] sm:$0xff]  ;;  %384 = vmatprep.mubr.msk.f32.mxu0 %vm448_vm0, %v447_v1  ;;  %v67_v5 = vld [vmem:[%s660_s2 + $0x28] sm:$0xff] }
   0x2   :  { %v84_v2 = vmul.f32 1.442695, %v69_v0  ;;  %v82_v4 = vmul.f32 1.442695, %v68_v3  ;;  %387 = vmatprep.subr.mxu1 %v447_v1  ;;  %391 = vmatprep.mubr.msk.f32.mxu1 %vm448_vm0, %v447_v1  ;;  %v80_v6 = vmul.f32 1.442695, %v67_v5 }
   0x3   :  { %v66_v7 = vld [vmem:[%s660_s2 + $0x20] sm:$0xff]  ;;  %v65_v9 = vld [vmem:[%s660_s2 + $0x18] sm:$0xff]  ;;  %v219_v11 = vld [vmem:[%s666_s8 + $0x8] sm:$0xff] }
   0x4   :  { %397 = vpow2.f32 %v84_v2  ;;  %v78_v8 = vmul.f32 1.442695, %v66_v7  ;;  %v76_v10 = vmul.f32 1.442695, %v65_v9  ;;  %v64_v12 = vld [vmem:[%s660_s2 + $0x10] sm:$0xff] }
   0x5   :  { %399 = vpow2.f32 %v82_v4  ;;  %v222_v13 = vmul.f32 1.442695, %v219_v11 }
   0x6   :  { %401 = vpow2.f32 %v80_v6 }
   0x7   :  { %403 = vpow2.f32 %v78_v8 }
   0x8   :  { %18 = vsyncpa [#allocation3], 0  ;;  %405 = vpow2.f32 %v222_v13  ;;  %v74_v14 = vmul.f32 1.442695, %v64_v12  ;;  %v61_v15 = vld [vmem:[%s661_s3 + $0x38] sm:$0xff]  ;;  %v63_v16 = vld [vmem:[%s660_s2 + $0x8] sm:$0xff] }
   0x9   :  { %407 = vpow2.f32 %v76_v10  ;;  %v60_v17 = vld [vmem:[%s661_s3 + $0x30] sm:$0xff]  ;;  %v53_v19 = vld [vmem:[%s659_s1 + $0x38] sm:$0xff]  ;;  %v72_v22 = vmul.f32 1.442695, %v63_v16  ;;  %vm115_vm1 = vcmask 261120   ;;  %v59_v26 = vld [vmem:[%s661_s3 + $0x28] sm:$0xff]  ;;  %v110_v10 = vlaneseq }
   0xa   :  { %409 = vpow2.f32 %v74_v14  ;;  %v52_v24 = vld [vmem:[%s659_s1 + $0x30] sm:$0xff]  ;;  %v62_v27 = vld [vmem:[%s660_s2] sm:$0xff]  ;;  %v51_v33 = vld [vmem:[%s659_s1 + $0x28] sm:$0xff]  ;;  %vm241_vm2 = vcmask 523264   ;;  %vm327_vm3 = vcmask 130048  }
   0xb   :  { %411 = vpow2.f32 %v72_v22  ;;  %v70_v31 = vmul.f32 1.442695, %v62_v27  ;;  %v58_v34 = vld [vmem:[%s661_s3 + $0x20] sm:$0xff]  ;;  %v217_v35 = vld [vmem:[%s667_s9 + $0x8] sm:$0xff]  ;;  %v57_v42 = vld [vmem:[%s661_s3 + $0x18] sm:$0xff]  ;;  %v111_v14 = vshrl.u32 %v110_v10, 7 }
   0xc   :  { %v215_v39 = vld [vmem:[%s665_s7 + $0x8] sm:$0xff]  ;;  %v50_v41 = vld [vmem:[%s659_s1 + $0x20] sm:$0xff]  ;;  %v49_v48 = vld [vmem:[%s659_s1 + $0x18] sm:$0xff] }
   0xd   :  { %413 = vpow2.f32 %v70_v31  ;;  %v56_v49 = vld [vmem:[%s661_s3 + $0x10] sm:$0xff]  ;;  %v55_v54 = vld [vmem:[%s661_s3 + $0x8] sm:$0xff]  ;;  %v54_v59 = vld [vmem:[%s661_s3] sm:$0xff] }
   0xe   :  { %v48_v53 = vld [vmem:[%s659_s1 + $0x10] sm:$0xff]  ;;  %v47_v58 = vld [vmem:[%s659_s1 + $0x8] sm:$0xff]  ;;  %v46_v62 = vld [vmem:[%s659_s1] sm:$0xff] }
   0xf   :  { %v45_v0 = vld [vmem:[%s658_s0] sm:$0xff] }
  0x10   :  { %v218_v2 = vld [vmem:[%s666_s8] sm:$0xff] }
  0x11   :  { %v398_v18 = vpop.eup %397  ;;  %v220_v3 = vmul.f32 1.442695, %v218_v2  ;;  %v216_v5 = vld [vmem:[%s667_s9] sm:$0xff] }
  0x12   :  { %v400_v20 = vpop.eup %399  ;;  %v93_v21 = vmul.f32 %v398_v18, %v61_v15  ;;  %v214_v6 = vld [vmem:[%s665_s7] sm:$0xff] }
  0x13   :  { %v402_v23 = vpop.eup %401  ;;  %v92_v25 = vmul.f32 %v400_v20, %v60_v17  ;;  %415 = vpow2.f32 %v220_v3  ;;  %v104_v8 = vld [vmem:[%s663_s5] sm:$0x1]  ;;  %v112_v17 = vsub.s32 0, %v111_v14 }
  0x14   :  { %v101_v28 = vadd.f32 %v93_v21, %v53_v19  ;;  %v91_v30 = vmul.f32 %v402_v23, %v59_v26  ;;  %v404_v32 = vpop.eup %403  ;;  %v105_v9 = vmul.f32 1.442695, %v104_v8  ;;  %v103_v12 = vld [vmem:[%s664_s6] sm:$0x1] }
  0x15   :  { %v100_v29 = vadd.f32 %v92_v25, %v52_v24  ;;  %v406_v36 = vpop.eup %405  ;;  %v90_v38 = vmul.f32 %v404_v32, %v58_v34  ;;  %v102_v15 = vld [vmem:[%s662_s4] sm:$0x1] }
  0x16   :  { %369 = vmatpush3.xpose.msk.msra.mxu0 %vm115_vm1, %v101_v28  ;;  %v99_v37 = vadd.f32 %v91_v30, %v51_v33  ;;  %v408_v40 = vpop.eup %407  ;;  %v225_v43 = vmul.f32 %v406_v36, %v217_v35  ;;  %417 = vpow2.f32 %v105_v9  ;;  %v230_v23 = vld [vmem:[%s669_s11] sm:$0x1]  ;;  %s449_s11 = smov [#allocation2]  }
  0x17   :  { %370 = vmatprep.subr.mxu0 %v447_v1  ;;  %v98_v45 = vadd.f32 %v90_v38, %v50_v41  ;;  %v89_v46 = vmul.f32 %v408_v40, %v57_v42  ;;  %v410_v47 = vpop.eup %409  ;;  %v231_v24 = vmul.f32 1.442695, %v230_v23  ;;  %v229_v26 = vld [vmem:[%s670_s12] sm:$0x1]  ;;  %s335_s20 = sshll.u32 %s449_s11, 4  ;;  %s336_s20 = int_to_ptr.vmem [resolvable:$true] %s335_s20 }
  0x18   :  { %v227_v44 = vadd.f32 %v225_v43, %v215_v39  ;;  %v88_v51 = vmul.f32 %v410_v47, %v56_v49  ;;  %v412_v52 = vpop.eup %411  ;;  %v228_v28 = vld [vmem:[%s668_s10] sm:$0x1]  ;;  %s425_s12 = scalar_lea.vmem %s336_s20, 128  ;;  %p430_p1 = scmp.lt.s32.totalorder %s336_s20, %s336_s20 }
  0x19   :  { %v97_v50 = vadd.f32 %v89_v46, %v49_v48  ;;  %v87_v56 = vmul.f32 %v412_v52, %v55_v54  ;;  %419 = vpow2.f32 %v231_v24  ;;  %p426_p0 = scmp.ne.s32.totalorder %s336_s20, %s425_s12  ;;  %p431_p2 = scmp.lt.s32.totalorder %s425_s12, %s425_s12 }
  0x1a   :  { %371 = vmatpush3.xpose.msk.msra.mxu0 %vm115_vm1, %v100_v29  ;;  %388 = vmatpush3.xpose.msk.msra.mxu1 %vm241_vm2, %v227_v44  ;;  %v96_v55 = vadd.f32 %v88_v51, %v48_v53  ;;  %v414_v57 = vpop.eup %413 }
  0x1b   :  { %372 = vmatprep.subr.mxu0 %v447_v1  ;;  %389 = vmatprep.subr.mxu1 %v447_v1  ;;  %v95_v60 = vadd.f32 %v87_v56, %v47_v58  ;;  %v86_v61 = vmul.f32 %v414_v57, %v54_v59  ;;  %p432_p3 = por %p431_p2, %p430_p1 }
  0x1d   :  { %v94_v63 = vadd.f32 %v86_v61, %v46_v62  ;;  %p433_p4 = pnand %p432_p3, %p426_p0 }
  0x1e   :  { %373 = vmatpush3.xpose.msk.msra.mxu0 %vm115_vm1, %v99_v37 }
  0x1f   :  { %374 = vmatprep.subr.mxu0 %v447_v1 }
  0x20   :  { %v416_v4 = vpop.eup %415 }
  0x22   :  { %375 = vmatpush3.xpose.msk.msra.mxu0 %vm115_vm1, %v98_v45 }
  0x23   :  { %376 = vmatprep.subr.mxu0 %v447_v1  ;;  %v418_v11 = vpop.eup %417 }
  0x24   :  { %v107_v13 = vmul.f32 %v418_v11, %v103_v12 }
  0x26   :  { %377 = vmatpush3.xpose.msk.msra.mxu0 %vm115_vm1, %v97_v50  ;;  %v108_v16 = vadd.f32 %v107_v13, %v102_v15  ;;  %v420_v25 = vpop.eup %419 }
  0x27   :  { %378 = vmatprep.subr.mxu0 %v447_v1  ;;  %v233_v27 = vmul.f32 %v420_v25, %v229_v26 }
  0x28   :  { %v113_v18 = vrot.slane %v108_v16, %v112_v17 }
  0x29   :  { %v234_v29 = vadd.f32 %v233_v27, %v228_v28 }
  0x2a   :  { %379 = vmatpush3.xpose.msk.msra.mxu0 %vm115_vm1, %v96_v55 }
  0x2b   :  { %380 = vmatprep.subr.mxu0 %v447_v1  ;;  %v239_v30 = vrot.slane %v234_v29, %v112_v17 }
  0x2e   :  { %381 = vmatpush3.xpose.msk.msra.mxu0 %vm115_vm1, %v95_v60 }
  0x2f   :  { %382 = vmatprep.subr.mxu0 %v447_v1  ;;  %v224_v1 = vmul.f32 %v416_v4, %v216_v5 }
  0x31   :  { %v226_v7 = vadd.f32 %v224_v1, %v214_v6 }
  0x32   :  { %383 = vmatpush3.xpose.msk.msra.mxu0 %vm115_vm1, %v94_v63 }
  0x33   :  { %390 = vmatpush3.xpose.msk.msra.mxu1 %vm241_vm2, %v226_v7 }
  0x35   :  { %385 = vmatmul.mubr.msk.f32.vlgmr.msra.gmra.mxu0 %vm115_vm1, %v45_v0 }
  0xf5   :  { %v209_v19 = vpop.f32.mrf.mxu0 }
  0xf6   :  { %v210_v20 = vadd.f32 %v209_v19, %v113_v18 }
  0xf7   :  { %v386_v21 = vpop.f32.mrf.mxu0 }
  0xf8   :  { %v213_v22 = vmax.f32 %v210_v20, 0.0 }
  0xfa   :  { %392 = vmatmul.mubr.msk.f32.vlgmr.msra.gmra.mxu1 %vm241_vm2, %v213_v22 }
 0x1ba   :  { %v317_v31 = vpop.f32.mrf.mxu1 }
 0x1bb   :  { %v318_v32 = vadd.f32 %v317_v31, %v239_v30 }
 0x1bc   :  { %v393_v33 = vpop.f32.mrf.mxu1 }
 0x1bd   :  { %v355_v34 = vmul.f32 -1.442695, %v318_v32 }
 0x1bf   :  { %421 = vpow2.f32 %v355_v34 }
 0x1cc   :  { %v422_v35 = vpop.eup %421 }
 0x1cd   :  { %v324_v36 = vadd.f32 1.0, %v422_v35 }
 0x1cf   :  { %423 = vrcp.f32 %v324_v36 }
 0x1dc   :  { %v424_v37 = vpop.eup %423 }
 0x1dd   :  { %328 = vst.msk [vmem:[#allocation2] sm:$0xff] %vm327_vm3, %v424_v37 }
 0x1de   :  { %436 = shalt.err (!%p433_p4)
}
 0x1df   :  { %338 = dma.vmem_to_hbm [thread:$0]  %s336_s20, 128, %s671_s13, [#allocation3]  }
 0x1e0   :  { %445 = dma.done.wait [#allocation3], 128  }
 0x1e1   :  { %446 = vsyncadd [#allocation3], 4294967168 }
 0x1e2   :  { %342 = vsyncpa [#allocation3], 1 }

</bundles_post_ra>
